<compile_context>
chip_gen: v7x
topology: tpu7x:2x2x1
jax: 0.10.0
libtpu: 0.0.40
codegen_flags: <defaults>
</compile_context>

<pallas_src>
import math

import numpy as np
import jax
import jax.numpy as jnp
from jax.experimental import pallas as pl
from jax.experimental.pallas import tpu as pltpu


def _gridmask_kernel(x_ref, rowb_ref, colb_ref, o_ref):
    # x_ref:    (1, C, tH, W)
    # rowb_ref: (1, tH, 1) int32  -- 1 where the row lies in a kept band (mode=1)
    # colb_ref: (1, 1, W)  int32  -- 1 where the col lies in a kept band (mode=1)
    x = x_ref[...]
    # Small-shape OR via add: (1,tH,1) + (1,1,W) -> (1,tH,W)
    band = rowb_ref[...] + colb_ref[...]
    band4 = jnp.broadcast_to(band[:, None, :, :], x.shape)
    # Single fused select; prob gate is already folded into the band vectors.
    o_ref[...] = jnp.where(band4 > 0, x, jnp.zeros_like(x))


def _pick_tile_h(c, h, w, itemsize, target_bytes=2 * 1024 * 1024):
    """Largest H-tile (multiple of 8, or full H) keeping one block ~<= 2 MiB."""
    if c * h * w * itemsize <= target_bytes:
        return h
    th = (target_bytes // (c * w * itemsize)) // 8 * 8
    return int(max(8, min(th, h)))


def gridmask_forward(x, row_band, col_band):
    """x: (N, C, H, W); row_band: (N, H, 1) int32; col_band: (N, 1, W) int32."""
    n, c, h, w = x.shape
    th = _pick_tile_h(c, h, w, x.dtype.itemsize)
    grid = (n, pl.cdiv(h, th))
    return pl.pallas_call(
        _gridmask_kernel,
        out_shape=jax.ShapeDtypeStruct(x.shape, x.dtype),
        grid=grid,
        in_specs=[
            pl.BlockSpec((1, c, th, w), lambda b, j: (b, 0, j, 0)),
            pl.BlockSpec((1, th, 1), lambda b, j: (b, j, 0)),
            pl.BlockSpec((1, 1, w), lambda b, j: (b, 0, 0)),
        ],
        out_specs=pl.BlockSpec((1, c, th, w), lambda b, j: (b, 0, j, 0)),
        compiler_params=pltpu.CompilerParams(
            dimension_semantics=("parallel", "parallel")),
    )(x, row_band, col_band)


def make_gridmask_bands(n, h, w, rng, d1=96, d2=224, ratio=0.4, prob=0.8):
    """Host-side mirror of Grid.__call__'s random parameter sampling.

    Returns per-sample band indicator vectors with the prob gate and mode=1
    inversion folded in: the kernel keeps pixel (r, c) iff row_band[r] | col_band[c].
    """
    hh = math.ceil(math.sqrt(h * h + w * w))
    row_band = np.zeros((n, h, 1), np.int32)
    col_band = np.zeros((n, 1, w), np.int32)
    rows = np.arange(h)
    cols = np.arange(w)
    for i in range(n):
        if rng.rand() > prob:
            # prob gate failed: pass-through (multiplier 1 everywhere).
            row_band[i, :, 0] = 1
            col_band[i, 0, :] = 1
            continue
        d = rng.randint(d1, d2)
        l = math.ceil(d * ratio)
        st_h = rng.randint(d)
        st_w = rng.randint(d)
        # TODO(synk): PIL mask.rotate(r) with r = randint(360) has no clean
        # Pallas/numpy equivalent here; rotation is skipped (r = 0).
        # Center-crop of the hh x hh mask folds into a phase offset on the bands.
        off_h = (hh - h) // 2 - st_h
        off_w = (hh - w) // 2 - st_w
        # mode == 1: final multiplier = row_in_band OR col_in_band.
        row_band[i, :, 0] = (((rows + off_h) % d) < l).astype(np.int32)
        col_band[i, 0, :] = (((cols + off_w) % d) < l).astype(np.int32)
    return jnp.asarray(row_band), jnp.asarray(col_band)


if __name__ == "__main__":
    n, c, h, w = 2, 4, 16, 16
    key = jax.random.PRNGKey(0)
    x = jax.random.normal(key, (n, c, h, w), dtype=jnp.float32)

    # GridMask defaults; self.training == True is assumed (eval mode is identity).
    rng = np.random.RandomState(0)
    row_band, col_band = make_gridmask_bands(n, h, w, rng,
                                             d1=96, d2=224, ratio=0.4, prob=0.8)

    y = gridmask_forward(x, row_band, col_band)
    jax.block_until_ready(y)
    assert y.shape == x.shape and y.dtype == x.dtype

    # Host reference check (same bands applied in numpy).
    rb = np.asarray(row_band)[:, :, 0]          # (n, h)
    cb = np.asarray(col_band)[:, 0, :]          # (n, w)
    mult = ((rb[:, :, None] + cb[:, None, :]) > 0).astype(np.float32)  # (n, h, w)
    ref = np.asarray(x) * mult[:, None, :, :]
    np.testing.assert_allclose(np.asarray(y), ref, rtol=0, atol=0)

    print("KERNEL_OK")
</pallas_src>

<mosaic_0001>
module attributes {stable_mosaic.version = 11 : i64} {
  func.func @_gridmask_kernel(%arg0: i32, %arg1: i32, %arg2: memref<1x4x16x16xf32, #tpu.memory_space<vmem>>, %arg3: memref<1x16x1xi32, #tpu.memory_space<vmem>>, %arg4: memref<1x1x16xi32, #tpu.memory_space<vmem>>, %arg5: memref<1x4x16x16xf32, #tpu.memory_space<vmem>>) attributes {dimension_semantics = [#tpu.dimension_semantics<parallel>, #tpu.dimension_semantics<parallel>], iteration_bounds = array<i64: 2, 1>, scalar_prefetch = 0 : i64, scratch_operands = 0 : i64, tpu.core_type = #tpu.core_type<tc>, window_params = [{transform_indices = @transform_0, window_bounds = array<i64: 1, 4, 16, 16>}, {transform_indices = @transform_1, window_bounds = array<i64: 1, 16, 1>}, {transform_indices = @transform_2, window_bounds = array<i64: 1, 1, 16>}, {transform_indices = @transform_3, window_bounds = array<i64: 1, 4, 16, 16>}]} {
    %c0 = arith.constant 0 : index
    %c0_0 = arith.constant 0 : index
    %c0_1 = arith.constant 0 : index
    %c0_2 = arith.constant 0 : index
    %0 = vector.load %arg2[%c0, %c0_0, %c0_1, %c0_2] : memref<1x4x16x16xf32, #tpu.memory_space<vmem>>, vector<1x4x16x16xf32>
    %c0_3 = arith.constant 0 : index
    %c0_4 = arith.constant 0 : index
    %c0_5 = arith.constant 0 : index
    %1 = vector.load %arg3[%c0_3, %c0_4, %c0_5] : memref<1x16x1xi32, #tpu.memory_space<vmem>>, vector<1x16x1xi32>
    %c0_6 = arith.constant 0 : index
    %c0_7 = arith.constant 0 : index
    %c0_8 = arith.constant 0 : index
    %2 = vector.load %arg4[%c0_6, %c0_7, %c0_8] : memref<1x1x16xi32, #tpu.memory_space<vmem>>, vector<1x1x16xi32>
    %3 = vector.broadcast %1 : vector<1x16x1xi32> to vector<1x16x16xi32>
    %4 = vector.broadcast %2 : vector<1x1x16xi32> to vector<1x16x16xi32>
    %5 = arith.addi %3, %4 : vector<1x16x16xi32>
    %6 = vector.shape_cast %5 : vector<1x16x16xi32> to vector<1x1x16x16xi32>
    %7 = vector.shape_cast %6 : vector<1x1x16x16xi32> to vector<1x1x16x16xi32>
    %8 = vector.broadcast %7 : vector<1x1x16x16xi32> to vector<1x4x16x16xi32>
    %c0_i32 = arith.constant 0 : i32
    %9 = vector.broadcast %c0_i32 : i32 to vector<1x4x16x16xi32>
    %10 = arith.cmpi sgt, %8, %9 : vector<1x4x16x16xi32>
    %cst = arith.constant 0.000000e+00 : f32
    %11 = vector.broadcast %cst : f32 to vector<1x4x16x16xf32>
    %12 = arith.select %10, %0, %11 : vector<1x4x16x16xi1>, vector<1x4x16x16xf32>
    %c0_9 = arith.constant 0 : index
    %c0_10 = arith.constant 0 : index
    %c0_11 = arith.constant 0 : index
    %c0_12 = arith.constant 0 : index
    %13 = vector.load %arg5[%c0_9, %c0_10, %c0_11, %c0_12] : memref<1x4x16x16xf32, #tpu.memory_space<vmem>>, vector<1x4x16x16xf32>
    tpu.vector_store %arg5[%c0_9, %c0_10, %c0_11, %c0_12], %12 {strides = array<i32>} : memref<1x4x16x16xf32, #tpu.memory_space<vmem>>, vector<1x4x16x16xf32>,
    return
  }
  func.func @transform_0(%arg0: i32, %arg1: i32) -> (i32, i32, i32, i32) {
    %c0_i32 = arith.constant 0 : i32
    %c0_i32_0 = arith.constant 0 : i32
    %c0_i32_1 = arith.constant 0 : i32
    return %arg0, %c0_i32, %arg1, %c0_i32_0 : i32, i32, i32, i32
  }
  func.func @transform_1(%arg0: i32, %arg1: i32) -> (i32, i32, i32) {
    %c0_i32 = arith.constant 0 : i32
    %c0_i32_0 = arith.constant 0 : i32
    return %arg0, %arg1, %c0_i32 : i32, i32, i32
  }
  func.func @transform_2(%arg0: i32, %arg1: i32) -> (i32, i32, i32) {
    %c0_i32 = arith.constant 0 : i32
    %c0_i32_0 = arith.constant 0 : i32
    %c0_i32_1 = arith.constant 0 : i32
    return %arg0, %c0_i32, %c0_i32_0 : i32, i32, i32
  }
  func.func @transform_3(%arg0: i32, %arg1: i32) -> (i32, i32, i32, i32) {
    %c0_i32 = arith.constant 0 : i32
    %c0_i32_0 = arith.constant 0 : i32
    %c0_i32_1 = arith.constant 0 : i32
    return %arg0, %c0_i32, %arg1, %c0_i32_0 : i32, i32, i32, i32
  }
}

</mosaic_0001>

<bundles_post_ra>
// kernel: tpu_custom_call.1
= control target key start
LH: loop header
LB: loop body
LE: loop exit
PB: predicated region body
PF: predicated region fallthrough
CT: control target
= control target key end

     0   :  { %8 = vsyncpa [#allocation3], 0  ;;  %s862_s0 = inlined_call_operand.hbm [shape: f32[2,4,16,16], index: 0, kind: input, shape index: {}]   ;;  %s863_s1 = inlined_call_operand.vmem [shape: s32[2,16,1], index: 1, kind: input, shape index: {}]   ;;  %s864_s2 = inlined_call_operand.vmem [shape: s32[2,1,16], index: 2, kind: input, shape index: {}]   ;;  %s865_s3 = inlined_call_operand.hbm [shape: f32[2,4,16,16], index: 3, kind: output, shape index: {}]  }
   0x1   :  { %10 = vsyncpa [#allocation3 + $0x1], 0 }
   0x2   :  { %11 = vsyncpa [#allocation4], 0 }
   0x3   :  { %13 = vsyncpa [#allocation4 + $0x1], 0  ;;  %s661_s12 = smov 0   ;;  %s663_s13 = smov 0  }
   0x4   :  { %s665_s14 = smov 0   ;;  %s667_s15 = smov 0  }
   0x5   :  { %s669_s16 = smov 0   ;;  %s671_s17 = smov 0  }
   0x6 LB: > { %s431_s18 = sadd.s32 4294967295, %s632_s17   ;;  %s432_s19 = sadd.s32 4294967294, %s632_s17   ;;  %s632_s17 = sphi %s671_s17, %s19_s17   ;;  %s628_s16 = sphi %s669_s16, %s880_s16   ;;  %s624_s15 = sphi %s667_s15, %s879_s15   ;;  %s620_s14 = sphi %s665_s14, %s878_s14   ;;  %s616_s13 = sphi %s663_s13, %s877_s13   ;;  %s612_s12 = sphi %s661_s12, %s876_s12  }
   0x7   : > { %s31_s20 = sadd.s32 1, %s628_s16  ;;  %s40_s21 = sadd.s32 1, %s620_s14 }
   0x8   : > { %p33_p0 = scmp.ge.s32.totalorder %s31_s20, 2  ;;  %p47_p1 = scmp.ne.s32.totalorder %s620_s14, %s616_s13 }
   0x9   : > { %p48_p2 = scmp.eq.s32.totalorder %s632_s17, 0  ;;  %p53_p3 = scmp.ne.s32.totalorder %s616_s13, %s612_s12 }
   0xa   : > { %s882_s20 = smov (%p33_p0, %s31_s20), 0  ;;  %p54_p5 = scmp.eq.s32.totalorder %s431_s18, 0 }
   0xb   : > { %p702_p4 = por %p48_p2, %p47_p1  ;;  %s35_s23 = ssub.s32 %s628_s16, %s882_s20 }
   0xc   : > { %p133_p6 = scmp.eq.s32.totalorder %s431_s18, 1  ;;  %p38_p7 = scmp.eq.s32.totalorder %s35_s23, 0 }
   0xd   : > { %p708_p8 = por %p54_p5, %p53_p3  ;;  %p139_p10 = scmp.eq.s32.totalorder %s432_s19, 1 }
   0xe   : > { %p712_p9 = por %p133_p6, %p47_p1  ;;  %p464_p13 = scmp.lt.s32.totalorder %s632_s17, 2 }
   0xf   : > { %s717_s26 = scalar_select %p38_p7, %s620_s14, %s40_s21  }
  0x10   : > { %s869_s25 = scalar_select %p712_p9, 1, 0 }
  0x11   : > { %p719_p11 = por %p139_p10, %p53_p3  ;;  %s159_s28 = sand.u32 1, %s620_s14  }
  0x12   : > { %s435_s29 = sshll.u32 %s159_s28, 6  ;;  %s449_s30 = sshll.u32 %s628_s16, 10 }
  0x13   : > { %s870_s27 = scalar_select %p719_p11, 1, 0 }
  0x14   : > { %s730_s6 = scalar_lea.hbm %s862_s0, %s449_s30  ;;  %s163_s7 = scalar_lea.vmem [#allocation2], %s435_s29 }
  0x15   : > { %s172_s8 = sshll.u32 %s163_s7, 4  ;;  %p736_p0 = pnand %p464_p13, %p702_p4  ;;  %s732_s8 = int_to_ptr.vmem [resolvable:$true] %s172_s8 }
  0x16   : > { %s741_s10 = scalar_lea.sflag [#allocation3], %s159_s28  ;;  %s520_s11 = scalar_lea.hbm %s730_s6, 1024 }
  0x17   : > { %p521_p2 = scmp.ne.s32.totalorder %s730_s6, %s520_s11  ;;  %p522_p3 = pneg %p736_p0 }
  0x18   : > { %s525_s21 = scalar_lea.hbm %s862_s0, 2048  ;;  %p526_p4 = scmp.lt.u32.totalorder %s730_s6, %s862_s0 }
  0x19   : > { %p523_p5 = pnand %p522_p3, %p521_p2  ;;  %p527_p7 = scmp.lt.u32.totalorder %s525_s21, %s520_s11 }
  0x1a   : > { %p529_p13 = scmp.lt.u32.totalorder %s520_s11, %s730_s6 }
  0x1b   : > { %p524_p6 = pneg %p523_p5  ;;  %p528_p10 = por %p527_p7, %p526_p4 }
  0x1d   : > { %p530_p12 = por %p529_p13, %p528_p10 }
  0x1f   : > { %p531_p1 = pnand %p530_p12, %p524_p6 }
  0x21   : > { %534 = shalt.err (!%p531_p1)
}
  0x22   : > { %s535_s28 = scalar_lea.vmem %s732_s8, 1024  ;;  %s634_s29 = smov [#allocation2]  }
  0x23   : > { %p536_p2 = scmp.ne.s32.totalorder %s732_s8, %s535_s28  ;;  %s540_s30 = sshll.u32 %s634_s29, 4  ;;  %s541_s30 = int_to_ptr.vmem [resolvable:$false] %s540_s30 }
  0x24   : > { %s542_s4 = scalar_lea.vmem %s541_s30, 2048  ;;  %p543_p9 = scmp.lt.s32.totalorder %s732_s8, %s541_s30 }
  0x25   : > { %p538_p5 = pnand %p536_p2, %p522_p3  ;;  %p544_p4 = scmp.lt.s32.totalorder %s542_s4, %s535_s28 }
  0x27   : > { %p539_p11 = pneg %p538_p5  ;;  %p545_p7 = por %p544_p4, %p543_p9 }
  0x29   : > { %p546_p10 = pnand %p545_p7, %p539_p11 }
  0x2b   : > { %549 = shalt.err (!%p546_p10)
}
  0x2c   : > { %s635_s5 = smov 128   ;;  %s636_s7 = smov 8  }
  0x2d   : > { %459 = dma.hbm_to_vmem [thread:$0]  (!%p736_p0), %s730_s6, 1024, %s732_s8, %s741_s10, %s635_s5, %s635_s5, %s636_s7  }
  0x2e   : > { %p199_p12 = scmp.lt.s32.totalorder %s632_s17, 3  ;;  %p872_p1 = scmp.ge.s32.totalorder %s632_s17, 1 }
  0x30   : > { %p200_p3 = pnand %p872_p1, %p199_p12 }
  0x31   : > { %s773_s11 = sand.u32 (!%p200_p3), 1, %s616_s13  }
  0x32   : > { %203 = sbr.rel (%p200_p3) target bundleno = 217 (0xd9), region = 32  ;;  %s439_s18 = sshll.u32 (!%p200_p3), %s773_s11, 6 }
  0x33   : > { %s206_s19 = scalar_lea.sflag (!%p200_p3), [#allocation3], %s773_s11  ;;  %s777_s21 = scalar_lea.vmem (!%p200_p3), [#allocation2], %s439_s18 }
  0x39   : > { %603 = dma.done.wait (%p708_p8), %s206_s19, 1024  }
  0x3a   : > { %605 = vsyncadd (%p708_p8), %s206_s19, 4294966272  ;;  %p246_p9 = scmp.lt.s32.totalorder %s624_s15, 1  ;;  %v637_v0 = vmov 0   ;;  %v259_v5 = vld [vmem:[%s777_s21] sm:$0xff]  ;;  %v261_v6 = vld [vmem:[%s777_s21 + $0x10] sm:$0xff]  ;;  %vm292_vm0 = vcmask 130048  }
  0x3b   : > { %519 = vset.pattern.permute.xlu0 %v637_v0  ;;  %v263_v7 = vld [vmem:[%s777_s21 + $0x20] sm:$0xff]  ;;  %v265_v8 = vld [vmem:[%s777_s21 + $0x30] sm:$0xff]  ;;  %s451_s29 = sshll.u32 %s624_s15, 10  ;;  %s243_s30 = scalar_lea.vmem [#allocation5], %s439_s18  ;;  %v260_v15 = vld [vmem:[%s777_s21 + $0x8] sm:$0xff] }
  0x3c   : > { %s247_s6 = scalar_select %p246_p9, %s624_s15, 1  ;;  %v262_v16 = vld [vmem:[%s777_s21 + $0x18] sm:$0xff]  ;;  %v264_v17 = vld [vmem:[%s777_s21 + $0x28] sm:$0xff] }
  0x3d   : > { %s317_s4 = sshll.u32 %s243_s30, 4  ;;  %v266_v18 = vld [vmem:[%s777_s21 + $0x38] sm:$0xff]  ;;  %s807_s7 = scalar_lea.hbm %s865_s3, %s451_s29  ;;  %s809_s4 = int_to_ptr.vmem [resolvable:$true] %s317_s4 }
  0x3e   : > { %s450_s8 = sshll.u32 %s247_s6, 4  ;;  %s257_s28 = scalar_lea.vmem %s864_s2, %s247_s6 }
  0x3f   : > { %s253_s22 = scalar_lea.vmem %s863_s1, %s450_s8  ;;  %v443_v3 = vld [vmem:[%s257_s28] ss:$0 sm:$0xff]  ;;  %s302_s18 = scalar_lea.sflag [#allocation4], %s773_s11 }
  0x40   : > { %v267_v1 = vld [vmem:[%s253_s22] sm:$0xff]  ;;  %v268_v2 = vld [vmem:[%s253_s22 + $0x8] sm:$0xff]  ;;  %s550_s19 = scalar_lea.vmem %s809_s4, 1024  ;;  %p873_p11 = scmp.ne.s32.totalorder %s869_s25, 0 }
  0x41   : > { %271 = vperm.xlu0 %519, %v267_v1   ;;  %p551_p8 = scmp.ne.s32.totalorder %s809_s4, %s550_s19  ;;  %s638_s21 = smov [#allocation5]  }
  0x42   : > { %s554_s6 = sshll.u32 %s638_s21, 4  ;;  %s555_s6 = int_to_ptr.vmem [resolvable:$false] %s554_s6 }
  0x43   : > { %p552_p0 = pnand %p551_p8, %p873_p11  ;;  %s556_s8 = scalar_lea.vmem %s555_s6, 2048 }
  0x44   : > { %p557_p13 = scmp.lt.s32.totalorder %s809_s4, %s555_s6  ;;  %p558_p2 = scmp.lt.s32.totalorder %s556_s8, %s550_s19 }
  0x45   : > { %274 = vperm.xlu0 %519, %v268_v2   ;;  %p553_p6 = pneg %p552_p0 }
  0x46   : > { %p559_p5 = por %p558_p2, %p557_p13 }
  0x48   : > { %p560_p4 = pnand %p559_p5, %p553_p6 }
  0xc0   : > { %v272_v4 = vpop.permute.xlu0 %271 }
  0xc1   : > { %v280_v9 = vadd.s32 %v443_v3, %v272_v4 }
  0xc3   : > { %vm282_vm1 = vcmp.gt.s32.totalorder %v280_v9, 0 }
  0xc4   : > { %v284_v10 = vsel %vm282_vm1, %v259_v5, 0.0  ;;  %v286_v11 = vsel %vm282_vm1, %v261_v6, 0.0  ;;  %v288_v12 = vsel %vm282_vm1, %v263_v7, 0.0  ;;  %v290_v13 = vsel %vm282_vm1, %v265_v8, 0.0  ;;  %v275_v14 = vpop.permute.xlu0 %274 }
  0xc5   : > { %293 = vst.msk [vmem:[%s243_s30] sm:$0xff] %vm292_vm0, %v284_v10  ;;  %295 = vst.msk [vmem:[%s243_s30 + $0x10] sm:$0xff] %vm292_vm0, %v286_v11  ;;  %v281_v19 = vadd.s32 %v443_v3, %v275_v14 }
  0xc6   : > { %297 = vst.msk [vmem:[%s243_s30 + $0x20] sm:$0xff] %vm292_vm0, %v288_v12  ;;  %299 = vst.msk [vmem:[%s243_s30 + $0x30] sm:$0xff] %vm292_vm0, %v290_v13 }
  0xc7   : > { %vm283_vm2 = vcmp.gt.s32.totalorder %v281_v19, 0 }
  0xc8   : > { %v285_v20 = vsel %vm283_vm2, %v260_v15, 0.0  ;;  %v287_v21 = vsel %vm283_vm2, %v262_v16, 0.0  ;;  %v289_v22 = vsel %vm283_vm2, %v264_v17, 0.0  ;;  %v291_v23 = vsel %vm283_vm2, %v266_v18, 0.0 }
  0xc9   : > { %294 = vst.msk [vmem:[%s243_s30 + $0x8] sm:$0xff] %vm292_vm0, %v285_v20  ;;  %296 = vst.msk [vmem:[%s243_s30 + $0x18] sm:$0xff] %vm292_vm0, %v287_v21 }
  0xca   : > { %298 = vst.msk [vmem:[%s243_s30 + $0x28] sm:$0xff] %vm292_vm0, %v289_v22  ;;  %300 = vst.msk [vmem:[%s243_s30 + $0x38] sm:$0xff] %vm292_vm0, %v291_v23 }
  0xcb   : > { %563 = shalt.err (!%p560_p4)
}
  0xcc   : > { %s564_s9 = scalar_lea.hbm %s807_s7, 1024  ;;  %s568_s24 = scalar_lea.hbm %s865_s3, 2048 }
  0xcd   : > { %p565_p7 = scmp.ne.s32.totalorder %s807_s7, %s564_s9  ;;  %p569_p1 = scmp.lt.u32.totalorder %s807_s7, %s865_s3 }
  0xce   : > { %p570_p3 = scmp.lt.u32.totalorder %s568_s24, %s564_s9  ;;  %p572_p8 = scmp.lt.u32.totalorder %s564_s9, %s807_s7 }
  0xcf   : > { %p566_p10 = pnand %p565_p7, %p873_p11 }
  0xd0   : > { %p571_p9 = por %p570_p3, %p569_p1 }
  0xd1   : > { %p567_p12 = pneg %p566_p10 }
  0xd2   : > { %p573_p0 = por %p572_p8, %p571_p9 }
  0xd4   : > { %p574_p6 = pnand %p573_p0, %p567_p12 }
  0xd6   : > { %577 = shalt.err (!%p574_p6)
}
  0xd7   : > { %s639_s29 = smov 128   ;;  %s640_s30 = smov 8  }
  0xd8   : > { %454 = dma.vmem_to_hbm [thread:$0]  (%p873_p11), %s809_s4, 1024, %s807_s7, %s302_s18, %s639_s29, %s639_s29, %s640_s30  }
  0xd9 PF: > { %s332_s15 = sand.u32 1, %s612_s12   ;;  %p874_p13 = scmp.ne.s32.totalorder %s870_s27, 0 }
  0xda   : > { %p875_p2 = scmp.ge.s32.totalorder %s632_s17, 2  ;;  %s333_s5 = scalar_lea.sflag [#allocation4], %s332_s15 }
  0xdc   : > { %p461_p5 = pnand %p875_p2, %p874_p13 }
  0xde   : > { %607 = dma.done.wait (!%p461_p5), %s333_s5, 1024  }
  0xdf   : > { %609 = vsyncadd (!%p461_p5), %s333_s5, 4294966272  ;;  %s19_s17 = sadd.s32 1, %s632_s17   ;;  %s876_s12 = smov %s616_s13 }
  0xe0   : > { %p16_p4 = scmp.ge.s32.totalorder %s19_s17, 4   ;;  %s877_s13 = smov %s620_s14 }
  0xe1   : > { %s878_s14 = smov %s717_s26  ;;  %s879_s15 = smov %s628_s16 }
  0xe2   : > { %s880_s16 = smov %s882_s20  ;;  %18 = sbr.rel (!%p16_p4) target bundleno = 6 (0x6), region = 83 }
  0xe9   :  { %338 = vsyncpa [#allocation3], 1 }
  0xea   :  { %340 = vsyncpa [#allocation3 + $0x1], 1 }
  0xeb   :  { %341 = vsyncpa [#allocation4], 1 }
  0xec   :  { %343 = vsyncpa [#allocation4 + $0x1], 1 }

</bundles_post_ra>
